<compile_context>
chip_gen: v5e
topology: v5e:2x2
jax: 0.10.0
libtpu: 0.0.40
codegen_flags: <defaults>
</compile_context>

<pallas_src>
import functools

import jax
import jax.numpy as jnp
import numpy as np
from jax.experimental import pallas as pl
from jax.experimental.pallas import tpu as pltpu


def _round_up(x, m):
    return (x + m - 1) // m * m


def _encoder_kernel(x_ref, w_ref, b_ref, y_ref, *, T, B, I, H, r_ih, r_hh, r_lin):
    """Single-invocation GRU + Linear forward.

    x_ref : (T*B, I)  f32   flattened input sequence
    w_ref : (R, W)    bf16  packed weight slab:
                              rows [r_ih , r_ih +I) -> W_ih^T  (3H cols used)
                              rows [r_hh , r_hh +H) -> W_hh^T  (3H cols used)
                              rows [r_lin, r_lin+H) -> W_lin^T (O  cols used)
    b_ref : (8, W)    f32   row 0: b_ih[r,z]+b_hh[r,z] ++ b_ih[n]
                            row 1: b_hh[n]
                            row 2: b_lin
    y_ref : (T*B, W)  f32   padded output (first O columns valid)
    """
    W = y_ref.shape[1]

    # ---- one-time loads / casts (off the serial critical path) -------------
    x = x_ref[...].astype(jnp.bfloat16)                       # (T*B, I)
    w_ih = w_ref[r_ih:r_ih + I, :]                            # (I, W) bf16
    w_hh = w_ref[r_hh:r_hh + H, :]                            # (H, W) bf16
    w_lin = w_ref[r_lin:r_lin + H, :]                         # (H, W) bf16

    bias_gi = b_ref[0:1, :]                                   # (1, W) f32
    # Hoisted broadcasts: JAX does not CSE broadcast_in_dim, so keep them out
    # of the unrolled recurrence.
    bhn_b = jnp.broadcast_to(b_ref[1:2, 0:H], (B, H))         # (B, H) f32
    blin_b = jnp.broadcast_to(b_ref[2:3, :], (B, W))          # (B, W) f32

    # ---- hoisted input projection: one (T*B, I) @ (I, W) bf16 matmul -------
    # bias_gi already holds b_ih[r,z] + b_hh[r,z] (folded) and b_ih[n];
    # b_hh[n] stays separate because PyTorch gates it by r.
    gi_all = jnp.dot(x, w_ih, preferred_element_type=jnp.float32) + bias_gi  # (T*B, W)

    # ---- serial GRU recurrence, fully unrolled (T small & static) ----------
    # PyTorch gate order [r, z, n]:
    #   r = sigmoid(gi_r + gh_r), z = sigmoid(gi_z + gh_z)
    #   n = tanh(gi_n + r * (gh_n + b_hh_n)),  h' = n + z * (h - n)
    h = jnp.zeros((B, H), jnp.float32)
    h_bf = h.astype(jnp.bfloat16)
    for t in range(T):
        gi_t = gi_all[t * B:(t + 1) * B, :]                                  # (B, W)
        gh = jnp.dot(h_bf, w_hh, preferred_element_type=jnp.float32)         # (B, W)

        rz = jax.nn.sigmoid(gi_t[:, :2 * H] + gh[:, :2 * H])                 # (B, 2H)
        r = rz[:, :H]
        z = rz[:, H:]
        n = jnp.tanh(gi_t[:, 2 * H:3 * H] + r * (gh[:, 2 * H:3 * H] + bhn_b))
        h = n + z * (h - n)                                                  # f32 state
        h_bf = h.astype(jnp.bfloat16)

        # Interleaved output projection: the (B,H)@(H,W) matmul fits in the MXU
        # slack left while the EUP runs sigmoid/tanh; lane-dense (B, W) store,
        # no VMEM scratch round-trip for the hidden states.
        y_t = jnp.dot(h_bf, w_lin, preferred_element_type=jnp.float32) + blin_b
        y_ref[t * B:(t + 1) * B, :] = y_t


def encoder_forward(x, w_ih_t, w_hh_t, b_ih, b_hh, w_lin_t, b_lin):
    """x: (T, B, I) float32 -> (T, B, O) float32 (matches nn.GRU + nn.Linear)."""
    T, B, I = x.shape
    H = w_hh_t.shape[0]
    O = w_lin_t.shape[1]

    # Lane-dense padded width covering the 3H gate columns and the O outputs.
    W = _round_up(max(3 * H, O, 128), 128)

    # Packed bf16 weight slab (one DMA).  Row offsets aligned to the bf16
    # sublane tile (16) so in-kernel row slices are tile-aligned.
    r_ih = 0
    r_hh = _round_up(I, 16)
    r_lin = r_hh + _round_up(H, 16)
    R = r_lin + _round_up(H, 16)

    w_slab = jnp.zeros((R, W), jnp.float32)
    w_slab = w_slab.at[r_ih:r_ih + I, :3 * H].set(w_ih_t)
    w_slab = w_slab.at[r_hh:r_hh + H, :3 * H].set(w_hh_t)
    w_slab = w_slab.at[r_lin:r_lin + H, :O].set(w_lin_t)
    w_slab = w_slab.astype(jnp.bfloat16)       # single-pass MXU inputs

    # Packed bias buffer (one DMA).  r/z biases are unconditional -> fold
    # b_ih + b_hh; b_hh[n] stays separate (gated by r inside the kernel).
    b_slab = jnp.zeros((8, W), jnp.float32)
    b_slab = b_slab.at[0, :2 * H].set(b_ih[0, :2 * H] + b_hh[0, :2 * H])
    b_slab = b_slab.at[0, 2 * H:3 * H].set(b_ih[0, 2 * H:])
    b_slab = b_slab.at[1, :H].set(b_hh[0, 2 * H:])
    b_slab = b_slab.at[2, :O].set(b_lin[0, :])

    x2d = x.reshape(T * B, I)

    kernel = functools.partial(_encoder_kernel, T=T, B=B, I=I, H=H,
                               r_ih=r_ih, r_hh=r_hh, r_lin=r_lin)
    vmem = pl.BlockSpec(memory_space=pltpu.MemorySpace.VMEM)

    y_pad = pl.pallas_call(
        kernel,
        out_shape=jax.ShapeDtypeStruct((T * B, W), jnp.float32),
        in_specs=[vmem, vmem, vmem],           # whole arrays resident in VMEM
        out_specs=vmem,
    )(x2d, w_slab, b_slab)

    # TODO(synk): for much larger T/B/H, switch to a T-chunked grid with a
    # carried h and re-derive the VMEM budget (64 MiB on v7x).
    return y_pad[:, :O].reshape(T, B, O)


def encoder_reference(x, w_ih_t, w_hh_t, b_ih, b_hh, w_lin_t, b_lin):
    """Pure-JAX f32 reference implementing torch.nn.GRU + Linear semantics."""
    T, B, _ = x.shape
    H = w_hh_t.shape[0]

    def step(h, x_t):
        gi = x_t @ w_ih_t + b_ih[0]
        gh = h @ w_hh_t + b_hh[0]
        i_r, i_z, i_n = gi[:, :H], gi[:, H:2 * H], gi[:, 2 * H:]
        h_r, h_z, h_n = gh[:, :H], gh[:, H:2 * H], gh[:, 2 * H:]
        r = jax.nn.sigmoid(i_r + h_r)
        z = jax.nn.sigmoid(i_z + h_z)
        n = jnp.tanh(i_n + r * h_n)
        h_new = (1.0 - z) * n + z * h
        return h_new, h_new

    h0 = jnp.zeros((B, H), jnp.float32)
    _, hs = jax.lax.scan(step, h0, x)          # (T, B, H)
    return hs @ w_lin_t + b_lin[0]


if __name__ == "__main__":
    # Small shapes consistent with the module's forward:
    #   inp: (seq=8, batch=8, input_size=16), hidden_size=32, output_size=16
    T, B, I, H, O = 8, 8, 16, 32, 16

    key = jax.random.PRNGKey(0)
    ks = jax.random.split(key, 7)
    k_gru = 1.0 / np.sqrt(H)   # PyTorch nn.GRU init: U(-1/sqrt(H), 1/sqrt(H))
    k_lin = 1.0 / np.sqrt(H)   # PyTorch nn.Linear init: U(-1/sqrt(in_features), ...)

    # Weights stored pre-transposed relative to PyTorch ((out, in) -> (in, out)).
    w_ih_t = jax.random.uniform(ks[0], (I, 3 * H), jnp.float32, -k_gru, k_gru)
    w_hh_t = jax.random.uniform(ks[1], (H, 3 * H), jnp.float32, -k_gru, k_gru)
    b_ih = jax.random.uniform(ks[2], (1, 3 * H), jnp.float32, -k_gru, k_gru)
    b_hh = jax.random.uniform(ks[3], (1, 3 * H), jnp.float32, -k_gru, k_gru)
    w_lin_t = jax.random.uniform(ks[4], (H, O), jnp.float32, -k_lin, k_lin)
    b_lin = jax.random.uniform(ks[5], (1, O), jnp.float32, -k_lin, k_lin)

    x = jax.random.normal(ks[6], (T, B, I), jnp.float32)

    y = encoder_forward(x, w_ih_t, w_hh_t, b_ih, b_hh, w_lin_t, b_lin)
    y = jax.block_until_ready(y)

    y_ref = encoder_reference(x, w_ih_t, w_hh_t, b_ih, b_hh, w_lin_t, b_lin)
    # bf16 MXU inputs with f32 accumulation -> compare at bf16-level tolerance.
    np.testing.assert_allclose(np.asarray(y), np.asarray(y_ref), rtol=2e-2, atol=2e-2)

    print("KERNEL_OK")
</pallas_src>

<mosaic_0001>
module attributes {stable_mosaic.version = 11 : i64} {
  func.func @_encoder_kernel(%arg0: memref<64x16xf32, #tpu.memory_space<vmem>>, %arg1: memref<80x128xbf16, #tpu.memory_space<vmem>>, %arg2: memref<8x128xf32, #tpu.memory_space<vmem>>, %arg3: memref<64x128xf32, #tpu.memory_space<vmem>>) attributes {dimension_semantics = [], scalar_prefetch = 0 : i64, scratch_operands = 0 : i64, tpu.core_type = #tpu.core_type<tc>} {
    %c0 = arith.constant 0 : index
    %c0_0 = arith.constant 0 : index
    %0 = vector.load %arg0[%c0, %c0_0] : memref<64x16xf32, #tpu.memory_space<vmem>>, vector<64x16xf32>
    %1 = arith.truncf %0 : vector<64x16xf32> to vector<64x16xbf16>
    %c0_1 = arith.constant 0 : index
    %c0_2 = arith.constant 0 : index
    %2 = vector.load %arg1[%c0_1, %c0_2] : memref<80x128xbf16, #tpu.memory_space<vmem>>, vector<16x128xbf16>
    %c16 = arith.constant 16 : index
    %c0_3 = arith.constant 0 : index
    %3 = vector.load %arg1[%c16, %c0_3] : memref<80x128xbf16, #tpu.memory_space<vmem>>, vector<32x128xbf16>
    %c48 = arith.constant 48 : index
    %c0_4 = arith.constant 0 : index
    %4 = vector.load %arg1[%c48, %c0_4] : memref<80x128xbf16, #tpu.memory_space<vmem>>, vector<32x128xbf16>
    %c0_5 = arith.constant 0 : index
    %c0_6 = arith.constant 0 : index
    %5 = vector.load %arg2[%c0_5, %c0_6] : memref<8x128xf32, #tpu.memory_space<vmem>>, vector<1x128xf32>
    %c1 = arith.constant 1 : index
    %c0_7 = arith.constant 0 : index
    %6 = vector.load %arg2[%c1, %c0_7] : memref<8x128xf32, #tpu.memory_space<vmem>>, vector<1x32xf32>
    %7 = vector.shape_cast %6 : vector<1x32xf32> to vector<1x32xf32>
    %8 = vector.broadcast %7 : vector<1x32xf32> to vector<8x32xf32>
    %c2 = arith.constant 2 : index
    %c0_8 = arith.constant 0 : index
    %9 = vector.load %arg2[%c2, %c0_8] : memref<8x128xf32, #tpu.memory_space<vmem>>, vector<1x128xf32>
    %10 = vector.shape_cast %9 : vector<1x128xf32> to vector<1x128xf32>
    %11 = vector.broadcast %10 : vector<1x128xf32> to vector<8x128xf32>
    %cst = arith.constant dense<0.000000e+00> : vector<64x128xf32>
    %12 = tpu.matmul %1, %2, %cst {dimension_numbers = #tpu.dot_dimension_numbers<[1], [0], [0], [1], [0, 0, 1, 1], [], []>} : vector<64x16xbf16>, vector<16x128xbf16>, vector<64x128xf32> -> vector<64x128xf32>
    %13 = vector.broadcast %5 : vector<1x128xf32> to vector<64x128xf32>
    %14 = arith.addf %12, %13 : vector<64x128xf32>
    %cst_9 = arith.constant 0.000000e+00 : f32
    %15 = vector.broadcast %cst_9 : f32 to vector<8x32xf32>
    %16 = arith.truncf %15 : vector<8x32xf32> to vector<8x32xbf16>
    %17 = vector.extract_strided_slice %14 {offsets = [0, 0], sizes = [8, 128], strides = [1, 1]} : vector<64x128xf32> to vector<8x128xf32>
    %cst_10 = arith.constant dense<0.000000e+00> : vector<8x128xf32>
    %18 = tpu.matmul %16, %3, %cst_10 {dimension_numbers = #tpu.dot_dimension_numbers<[1], [0], [0], [1], [0, 0, 1, 1], [], []>} : vector<8x32xbf16>, vector<32x128xbf16>, vector<8x128xf32> -> vector<8x128xf32>
    %19 = vector.extract_strided_slice %17 {offsets = [0, 0], sizes = [8, 64], strides = [1, 1]} : vector<8x128xf32> to vector<8x64xf32>
    %20 = vector.extract_strided_slice %18 {offsets = [0, 0], sizes = [8, 64], strides = [1, 1]} : vector<8x128xf32> to vector<8x64xf32>
    %21 = arith.addf %19, %20 : vector<8x64xf32>
    %22 = arith.negf %21 : vector<8x64xf32>
    %23 = math.exp %22 : vector<8x64xf32>
    %cst_11 = arith.constant 1.000000e+00 : f32
    %24 = vector.broadcast %cst_11 : f32 to vector<8x64xf32>
    %25 = arith.addf %24, %23 : vector<8x64xf32>
    %26 = arith.divf %24, %25 : vector<8x64xf32>
    %27 = vector.extract_strided_slice %26 {offsets = [0, 0], sizes = [8, 32], strides = [1, 1]} : vector<8x64xf32> to vector<8x32xf32>
    %28 = vector.extract_strided_slice %26 {offsets = [0, 32], sizes = [8, 32], strides = [1, 1]} : vector<8x64xf32> to vector<8x32xf32>
    %29 = vector.extract_strided_slice %17 {offsets = [0, 64], sizes = [8, 32], strides = [1, 1]} : vector<8x128xf32> to vector<8x32xf32>
    %30 = vector.extract_strided_slice %18 {offsets = [0, 64], sizes = [8, 32], strides = [1, 1]} : vector<8x128xf32> to vector<8x32xf32>
    %31 = arith.addf %30, %8 : vector<8x32xf32>
    %32 = arith.mulf %27, %31 : vector<8x32xf32>
    %33 = arith.addf %29, %32 : vector<8x32xf32>
    %34 = math.tanh %33 : vector<8x32xf32>
    %35 = arith.subf %15, %34 : vector<8x32xf32>
    %36 = arith.mulf %28, %35 : vector<8x32xf32>
    %37 = arith.addf %34, %36 : vector<8x32xf32>
    %38 = arith.truncf %37 : vector<8x32xf32> to vector<8x32xbf16>
    %cst_12 = arith.constant dense<0.000000e+00> : vector<8x128xf32>
    %39 = tpu.matmul %38, %4, %cst_12 {dimension_numbers = #tpu.dot_dimension_numbers<[1], [0], [0], [1], [0, 0, 1, 1], [], []>} : vector<8x32xbf16>, vector<32x128xbf16>, vector<8x128xf32> -> vector<8x128xf32>
    %40 = arith.addf %39, %11 : vector<8x128xf32>
    %c0_13 = arith.constant 0 : index
    %c0_14 = arith.constant 0 : index
    %41 = vector.load %arg3[%c0_13, %c0_14] : memref<64x128xf32, #tpu.memory_space<vmem>>, vector<8x128xf32>
    tpu.vector_store %arg3[%c0_13, %c0_14], %40 {strides = array<i32>} : memref<64x128xf32, #tpu.memory_space<vmem>>, vector<8x128xf32>,
    %42 = vector.extract_strided_slice %14 {offsets = [8, 0], sizes = [8, 128], strides = [1, 1]} : vector<64x128xf32> to vector<8x128xf32>
    %cst_15 = arith.constant dense<0.000000e+00> : vector<8x128xf32>
    %43 = tpu.matmul %38, %3, %cst_15 {dimension_numbers = #tpu.dot_dimension_numbers<[1], [0], [0], [1], [0, 0, 1, 1], [], []>} : vector<8x32xbf16>, vector<32x128xbf16>, vector<8x128xf32> -> vector<8x128xf32>
    %44 = vector.extract_strided_slice %42 {offsets = [0, 0], sizes = [8, 64], strides = [1, 1]} : vector<8x128xf32> to vector<8x64xf32>
    %45 = vector.extract_strided_slice %43 {offsets = [0, 0], sizes = [8, 64], strides = [1, 1]} : vector<8x128xf32> to vector<8x64xf32>
    %46 = arith.addf %44, %45 : vector<8x64xf32>
    %47 = arith.negf %46 : vector<8x64xf32>
    %48 = math.exp %47 : vector<8x64xf32>
    %cst_16 = arith.constant 1.000000e+00 : f32
    %49 = vector.broadcast %cst_16 : f32 to vector<8x64xf32>
    %50 = arith.addf %49, %48 : vector<8x64xf32>
    %51 = arith.divf %49, %50 : vector<8x64xf32>
    %52 = vector.extract_strided_slice %51 {offsets = [0, 0], sizes = [8, 32], strides = [1, 1]} : vector<8x64xf32> to vector<8x32xf32>
    %53 = vector.extract_strided_slice %51 {offsets = [0, 32], sizes = [8, 32], strides = [1, 1]} : vector<8x64xf32> to vector<8x32xf32>
    %54 = vector.extract_strided_slice %42 {offsets = [0, 64], sizes = [8, 32], strides = [1, 1]} : vector<8x128xf32> to vector<8x32xf32>
    %55 = vector.extract_strided_slice %43 {offsets = [0, 64], sizes = [8, 32], strides = [1, 1]} : vector<8x128xf32> to vector<8x32xf32>
    %56 = arith.addf %55, %8 : vector<8x32xf32>
    %57 = arith.mulf %52, %56 : vector<8x32xf32>
    %58 = arith.addf %54, %57 : vector<8x32xf32>
    %59 = math.tanh %58 : vector<8x32xf32>
    %60 = arith.subf %37, %59 : vector<8x32xf32>
    %61 = arith.mulf %53, %60 : vector<8x32xf32>
    %62 = arith.addf %59, %61 : vector<8x32xf32>
    %63 = arith.truncf %62 : vector<8x32xf32> to vector<8x32xbf16>
    %cst_17 = arith.constant dense<0.000000e+00> : vector<8x128xf32>
    %64 = tpu.matmul %63, %4, %cst_17 {dimension_numbers = #tpu.dot_dimension_numbers<[1], [0], [0], [1], [0, 0, 1, 1], [], []>} : vector<8x32xbf16>, vector<32x128xbf16>, vector<8x128xf32> -> vector<8x128xf32>
    %65 = arith.addf %64, %11 : vector<8x128xf32>
    %c8 = arith.constant 8 : index
    %c0_18 = arith.constant 0 : index
    %66 = vector.load %arg3[%c8, %c0_18] : memref<64x128xf32, #tpu.memory_space<vmem>>, vector<8x128xf32>
    tpu.vector_store %arg3[%c8, %c0_18], %65 {strides = array<i32>} : memref<64x128xf32, #tpu.memory_space<vmem>>, vector<8x128xf32>,
    %67 = vector.extract_strided_slice %14 {offsets = [16, 0], sizes = [8, 128], strides = [1, 1]} : vector<64x128xf32> to vector<8x128xf32>
    %cst_19 = arith.constant dense<0.000000e+00> : vector<8x128xf32>
    %68 = tpu.matmul %63, %3, %cst_19 {dimension_numbers = #tpu.dot_dimension_numbers<[1], [0], [0], [1], [0, 0, 1, 1], [], []>} : vector<8x32xbf16>, vector<32x128xbf16>, vector<8x128xf32> -> vector<8x128xf32>
    %69 = vector.extract_strided_slice %67 {offsets = [0, 0], sizes = [8, 64], strides = [1, 1]} : vector<8x128xf32> to vector<8x64xf32>
    %70 = vector.extract_strided_slice %68 {offsets = [0, 0], sizes = [8, 64], strides = [1, 1]} : vector<8x128xf32> to vector<8x64xf32>
    %71 = arith.addf %69, %70 : vector<8x64xf32>
    %72 = arith.negf %71 : vector<8x64xf32>
    %73 = math.exp %72 : vector<8x64xf32>
    %cst_20 = arith.constant 1.000000e+00 : f32
    %74 = vector.broadcast %cst_20 : f32 to vector<8x64xf32>
    %75 = arith.addf %74, %73 : vector<8x64xf32>
    %76 = arith.divf %74, %75 : vector<8x64xf32>
    %77 = vector.extract_strided_slice %76 {offsets = [0, 0], sizes = [8, 32], strides = [1, 1]} : vector<8x64xf32> to vector<8x32xf32>
    %78 = vector.extract_strided_slice %76 {offsets = [0, 32], sizes = [8, 32], strides = [1, 1]} : vector<8x64xf32> to vector<8x32xf32>
    %79 = vector.extract_strided_slice %67 {offsets = [0, 64], sizes = [8, 32], strides = [1, 1]} : vector<8x128xf32> to vector<8x32xf32>
    %80 = vector.extract_strided_slice %68 {offsets = [0, 64], sizes = [8, 32], strides = [1, 1]} : vector<8x128xf32> to vector<8x32xf32>
    %81 = arith.addf %80, %8 : vector<8x32xf32>
    %82 = arith.mulf %77, %81 : vector<8x32xf32>
    %83 = arith.addf %79, %82 : vector<8x32xf32>
    %84 = math.tanh %83 : vector<8x32xf32>
    %85 = arith.subf %62, %84 : vector<8x32xf32>
    %86 = arith.mulf %78, %85 : vector<8x32xf32>
    %87 = arith.addf %84, %86 : vector<8x32xf32>
    %88 = arith.truncf %87 : vector<8x32xf32> to vector<8x32xbf16>
    %cst_21 = arith.constant dense<0.000000e+00> : vector<8x128xf32>
    %89 = tpu.matmul %88, %4, %cst_21 {dimension_numbers = #tpu.dot_dimension_numbers<[1], [0], [0], [1], [0, 0, 1, 1], [], []>} : vector<8x32xbf16>, vector<32x128xbf16>, vector<8x128xf32> -> vector<8x128xf32>
    %90 = arith.addf %89, %11 : vector<8x128xf32>
    %c16_22 = arith.constant 16 : index
    %c0_23 = arith.constant 0 : index
    %91 = vector.load %arg3[%c16_22, %c0_23] : memref<64x128xf32, #tpu.memory_space<vmem>>, vector<8x128xf32>
    tpu.vector_store %arg3[%c16_22, %c0_23], %90 {strides = array<i32>} : memref<64x128xf32, #tpu.memory_space<vmem>>, vector<8x128xf32>,
    %92 = vector.extract_strided_slice %14 {offsets = [24, 0], sizes = [8, 128], strides = [1, 1]} : vector<64x128xf32> to vector<8x128xf32>
    %cst_24 = arith.constant dense<0.000000e+00> : vector<8x128xf32>
    %93 = tpu.matmul %88, %3, %cst_24 {dimension_numbers = #tpu.dot_dimension_numbers<[1], [0], [0], [1], [0, 0, 1, 1], [], []>} : vector<8x32xbf16>, vector<32x128xbf16>, vector<8x128xf32> -> vector<8x128xf32>
    %94 = vector.extract_strided_slice %92 {offsets = [0, 0], sizes = [8, 64], strides = [1, 1]} : vector<8x128xf32> to vector<8x64xf32>
    %95 = vector.extract_strided_slice %93 {offsets = [0, 0], sizes = [8, 64], strides = [1, 1]} : vector<8x128xf32> to vector<8x64xf32>
    %96 = arith.addf %94, %95 : vector<8x64xf32>
    %97 = arith.negf %96 : vector<8x64xf32>
    %98 = math.exp %97 : vector<8x64xf32>
    %cst_25 = arith.constant 1.000000e+00 : f32
    %99 = vector.broadcast %cst_25 : f32 to vector<8x64xf32>
    %100 = arith.addf %99, %98 : vector<8x64xf32>
    %101 = arith.divf %99, %100 : vector<8x64xf32>
    %102 = vector.extract_strided_slice %101 {offsets = [0, 0], sizes = [8, 32], strides = [1, 1]} : vector<8x64xf32> to vector<8x32xf32>
    %103 = vector.extract_strided_slice %101 {offsets = [0, 32], sizes = [8, 32], strides = [1, 1]} : vector<8x64xf32> to vector<8x32xf32>
    %104 = vector.extract_strided_slice %92 {offsets = [0, 64], sizes = [8, 32], strides = [1, 1]} : vector<8x128xf32> to vector<8x32xf32>
    %105 = vector.extract_strided_slice %93 {offsets = [0, 64], sizes = [8, 32], strides = [1, 1]} : vector<8x128xf32> to vector<8x32xf32>
    %106 = arith.addf %105, %8 : vector<8x32xf32>
    %107 = arith.mulf %102, %106 : vector<8x32xf32>
    %108 = arith.addf %104, %107 : vector<8x32xf32>
    %109 = math.tanh %108 : vector<8x32xf32>
    %110 = arith.subf %87, %109 : vector<8x32xf32>
    %111 = arith.mulf %103, %110 : vector<8x32xf32>
    %112 = arith.addf %109, %111 : vector<8x32xf32>
    %113 = arith.truncf %112 : vector<8x32xf32> to vector<8x32xbf16>
    %cst_26 = arith.constant dense<0.000000e+00> : vector<8x128xf32>
    %114 = tpu.matmul %113, %4, %cst_26 {dimension_numbers = #tpu.dot_dimension_numbers<[1], [0], [0], [1], [0, 0, 1, 1], [], []>} : vector<8x32xbf16>, vector<32x128xbf16>, vector<8x128xf32> -> vector<8x128xf32>
    %115 = arith.addf %114, %11 : vector<8x128xf32>
    %c24 = arith.constant 24 : index
    %c0_27 = arith.constant 0 : index
    %116 = vector.load %arg3[%c24, %c0_27] : memref<64x128xf32, #tpu.memory_space<vmem>>, vector<8x128xf32>
    tpu.vector_store %arg3[%c24, %c0_27], %115 {strides = array<i32>} : memref<64x128xf32, #tpu.memory_space<vmem>>, vector<8x128xf32>,
    %117 = vector.extract_strided_slice %14 {offsets = [32, 0], sizes = [8, 128], strides = [1, 1]} : vector<64x128xf32> to vector<8x128xf32>
    %cst_28 = arith.constant dense<0.000000e+00> : vector<8x128xf32>
    %118 = tpu.matmul %113, %3, %cst_28 {dimension_numbers = #tpu.dot_dimension_numbers<[1], [0], [0], [1], [0, 0, 1, 1], [], []>} : vector<8x32xbf16>, vector<32x128xbf16>, vector<8x128xf32> -> vector<8x128xf32>
    %119 = vector.extract_strided_slice %117 {offsets = [0, 0], sizes = [8, 64], strides = [1, 1]} : vector<8x128xf32> to vector<8x64xf32>
    %120 = vector.extract_strided_slice %118 {offsets = [0, 0], sizes = [8, 64], strides = [1, 1]} : vector<8x128xf32> to vector<8x64xf32>
    %121 = arith.addf %119, %120 : vector<8x64xf32>
    %122 = arith.negf %121 : vector<8x64xf32>
    %123 = math.exp %122 : vector<8x64xf32>
    %cst_29 = arith.constant 1.000000e+00 : f32
    %124 = vector.broadcast %cst_29 : f32 to vector<8x64xf32>
    %125 = arith.addf %124, %123 : vector<8x64xf32>
    %126 = arith.divf %124, %125 : vector<8x64xf32>
    %127 = vector.extract_strided_slice %126 {offsets = [0, 0], sizes = [8, 32], strides = [1, 1]} : vector<8x64xf32> to vector<8x32xf32>
    %128 = vector.extract_strided_slice %126 {offsets = [0, 32], sizes = [8, 32], strides = [1, 1]} : vector<8x64xf32> to vector<8x32xf32>
    %129 = vector.extract_strided_slice %117 {offsets = [0, 64], sizes = [8, 32], strides = [1, 1]} : vector<8x128xf32> to vector<8x32xf32>
    %130 = vector.extract_strided_slice %118 {offsets = [0, 64], sizes = [8, 32], strides = [1, 1]} : vector<8x128xf32> to vector<8x32xf32>
    %131 = arith.addf %130, %8 : vector<8x32xf32>
    %132 = arith.mulf %127, %131 : vector<8x32xf32>
    %133 = arith.addf %129, %132 : vector<8x32xf32>
    %134 = math.tanh %133 : vector<8x32xf32>
    %135 = arith.subf %112, %134 : vector<8x32xf32>
    %136 = arith.mulf %128, %135 : vector<8x32xf32>
    %137 = arith.addf %134, %136 : vector<8x32xf32>
    %138 = arith.truncf %137 : vector<8x32xf32> to vector<8x32xbf16>
    %cst_30 = arith.constant dense<0.000000e+00> : vector<8x128xf32>
    %139 = tpu.matmul %138, %4, %cst_30 {dimension_numbers = #tpu.dot_dimension_numbers<[1], [0], [0], [1], [0, 0, 1, 1], [], []>} : vector<8x32xbf16>, vector<32x128xbf16>, vector<8x128xf32> -> vector<8x128xf32>
    %140 = arith.addf %139, %11 : vector<8x128xf32>
    %c32 = arith.constant 32 : index
    %c0_31 = arith.constant 0 : index
    %141 = vector.load %arg3[%c32, %c0_31] : memref<64x128xf32, #tpu.memory_space<vmem>>, vector<8x128xf32>
    tpu.vector_store %arg3[%c32, %c0_31], %140 {strides = array<i32>} : memref<64x128xf32, #tpu.memory_space<vmem>>, vector<8x128xf32>,
    %142 = vector.extract_strided_slice %14 {offsets = [40, 0], sizes = [8, 128], strides = [1, 1]} : vector<64x128xf32> to vector<8x128xf32>
    %cst_32 = arith.constant dense<0.000000e+00> : vector<8x128xf32>
    %143 = tpu.matmul %138, %3, %cst_32 {dimension_numbers = #tpu.dot_dimension_numbers<[1], [0], [0], [1], [0, 0, 1, 1], [], []>} : vector<8x32xbf16>, vector<32x128xbf16>, vector<8x128xf32> -> vector<8x128xf32>
    %144 = vector.extract_strided_slice %142 {offsets = [0, 0], sizes = [8, 64], strides = [1, 1]} : vector<8x128xf32> to vector<8x64xf32>
    %145 = vector.extract_strided_slice %143 {offsets = [0, 0], sizes = [8, 64], strides = [1, 1]} : vector<8x128xf32> to vector<8x64xf32>
    %146 = arith.addf %144, %145 : vector<8x64xf32>
    %147 = arith.negf %146 : vector<8x64xf32>
    %148 = math.exp %147 : vector<8x64xf32>
    %cst_33 = arith.constant 1.000000e+00 : f32
    %149 = vector.broadcast %cst_33 : f32 to vector<8x64xf32>
    %150 = arith.addf %149, %148 : vector<8x64xf32>
    %151 = arith.divf %149, %150 : vector<8x64xf32>
    %152 = vector.extract_strided_slice %151 {offsets = [0, 0], sizes = [8, 32], strides = [1, 1]} : vector<8x64xf32> to vector<8x32xf32>
    %153 = vector.extract_strided_slice %151 {offsets = [0, 32], sizes = [8, 32], strides = [1, 1]} : vector<8x64xf32> to vector<8x32xf32>
    %154 = vector.extract_strided_slice %142 {offsets = [0, 64], sizes = [8, 32], strides = [1, 1]} : vector<8x128xf32> to vector<8x32xf32>
    %155 = vector.extract_strided_slice %143 {offsets = [0, 64], sizes = [8, 32], strides = [1, 1]} : vector<8x128xf32> to vector<8x32xf32>
    %156 = arith.addf %155, %8 : vector<8x32xf32>
    %157 = arith.mulf %152, %156 : vector<8x32xf32>
    %158 = arith.addf %154, %157 : vector<8x32xf32>
    %159 = math.tanh %158 : vector<8x32xf32>
    %160 = arith.subf %137, %159 : vector<8x32xf32>
    %161 = arith.mulf %153, %160 : vector<8x32xf32>
    %162 = arith.addf %159, %161 : vector<8x32xf32>
    %163 = arith.truncf %162 : vector<8x32xf32> to vector<8x32xbf16>
    %cst_34 = arith.constant dense<0.000000e+00> : vector<8x128xf32>
    %164 = tpu.matmul %163, %4, %cst_34 {dimension_numbers = #tpu.dot_dimension_numbers<[1], [0], [0], [1], [0, 0, 1, 1], [], []>} : vector<8x32xbf16>, vector<32x128xbf16>, vector<8x128xf32> -> vector<8x128xf32>
    %165 = arith.addf %164, %11 : vector<8x128xf32>
    %c40 = arith.constant 40 : index
    %c0_35 = arith.constant 0 : index
    %166 = vector.load %arg3[%c40, %c0_35] : memref<64x128xf32, #tpu.memory_space<vmem>>, vector<8x128xf32>
    tpu.vector_store %arg3[%c40, %c0_35], %165 {strides = array<i32>} : memref<64x128xf32, #tpu.memory_space<vmem>>, vector<8x128xf32>,
    %167 = vector.extract_strided_slice %14 {offsets = [48, 0], sizes = [8, 128], strides = [1, 1]} : vector<64x128xf32> to vector<8x128xf32>
    %cst_36 = arith.constant dense<0.000000e+00> : vector<8x128xf32>
    %168 = tpu.matmul %163, %3, %cst_36 {dimension_numbers = #tpu.dot_dimension_numbers<[1], [0], [0], [1], [0, 0, 1, 1], [], []>} : vector<8x32xbf16>, vector<32x128xbf16>, vector<8x128xf32> -> vector<8x128xf32>
    %169 = vector.extract_strided_slice %167 {offsets = [0, 0], sizes = [8, 64], strides = [1, 1]} : vector<8x128xf32> to vector<8x64xf32>
    %170 = vector.extract_strided_slice %168 {offsets = [0, 0], sizes = [8, 64], strides = [1, 1]} : vector<8x128xf32> to vector<8x64xf32>
    %171 = arith.addf %169, %170 : vector<8x64xf32>
    %172 = arith.negf %171 : vector<8x64xf32>
    %173 = math.exp %172 : vector<8x64xf32>
    %cst_37 = arith.constant 1.000000e+00 : f32
    %174 = vector.broadcast %cst_37 : f32 to vector<8x64xf32>
    %175 = arith.addf %174, %173 : vector<8x64xf32>
    %176 = arith.divf %174, %175 : vector<8x64xf32>
    %177 = vector.extract_strided_slice %176 {offsets = [0, 0], sizes = [8, 32], strides = [1, 1]} : vector<8x64xf32> to vector<8x32xf32>
    %178 = vector.extract_strided_slice %176 {offsets = [0, 32], sizes = [8, 32], strides = [1, 1]} : vector<8x64xf32> to vector<8x32xf32>
    %179 = vector.extract_strided_slice %167 {offsets = [0, 64], sizes = [8, 32], strides = [1, 1]} : vector<8x128xf32> to vector<8x32xf32>
    %180 = vector.extract_strided_slice %168 {offsets = [0, 64], sizes = [8, 32], strides = [1, 1]} : vector<8x128xf32> to vector<8x32xf32>
    %181 = arith.addf %180, %8 : vector<8x32xf32>
    %182 = arith.mulf %177, %181 : vector<8x32xf32>
    %183 = arith.addf %179, %182 : vector<8x32xf32>
    %184 = math.tanh %183 : vector<8x32xf32>
    %185 = arith.subf %162, %184 : vector<8x32xf32>
    %186 = arith.mulf %178, %185 : vector<8x32xf32>
    %187 = arith.addf %184, %186 : vector<8x32xf32>
    %188 = arith.truncf %187 : vector<8x32xf32> to vector<8x32xbf16>
    %cst_38 = arith.constant dense<0.000000e+00> : vector<8x128xf32>
    %189 = tpu.matmul %188, %4, %cst_38 {dimension_numbers = #tpu.dot_dimension_numbers<[1], [0], [0], [1], [0, 0, 1, 1], [], []>} : vector<8x32xbf16>, vector<32x128xbf16>, vector<8x128xf32> -> vector<8x128xf32>
    %190 = arith.addf %189, %11 : vector<8x128xf32>
    %c48_39 = arith.constant 48 : index
    %c0_40 = arith.constant 0 : index
    %191 = vector.load %arg3[%c48_39, %c0_40] : memref<64x128xf32, #tpu.memory_space<vmem>>, vector<8x128xf32>
    tpu.vector_store %arg3[%c48_39, %c0_40], %190 {strides = array<i32>} : memref<64x128xf32, #tpu.memory_space<vmem>>, vector<8x128xf32>,
    %192 = vector.extract_strided_slice %14 {offsets = [56, 0], sizes = [8, 128], strides = [1, 1]} : vector<64x128xf32> to vector<8x128xf32>
    %cst_41 = arith.constant dense<0.000000e+00> : vector<8x128xf32>
    %193 = tpu.matmul %188, %3, %cst_41 {dimension_numbers = #tpu.dot_dimension_numbers<[1], [0], [0], [1], [0, 0, 1, 1], [], []>} : vector<8x32xbf16>, vector<32x128xbf16>, vector<8x128xf32> -> vector<8x128xf32>
    %194 = vector.extract_strided_slice %192 {offsets = [0, 0], sizes = [8, 64], strides = [1, 1]} : vector<8x128xf32> to vector<8x64xf32>
    %195 = vector.extract_strided_slice %193 {offsets = [0, 0], sizes = [8, 64], strides = [1, 1]} : vector<8x128xf32> to vector<8x64xf32>
    %196 = arith.addf %194, %195 : vector<8x64xf32>
    %197 = arith.negf %196 : vector<8x64xf32>
    %198 = math.exp %197 : vector<8x64xf32>
    %cst_42 = arith.constant 1.000000e+00 : f32
    %199 = vector.broadcast %cst_42 : f32 to vector<8x64xf32>
    %200 = arith.addf %199, %198 : vector<8x64xf32>
    %201 = arith.divf %199, %200 : vector<8x64xf32>
    %202 = vector.extract_strided_slice %201 {offsets = [0, 0], sizes = [8, 32], strides = [1, 1]} : vector<8x64xf32> to vector<8x32xf32>
    %203 = vector.extract_strided_slice %201 {offsets = [0, 32], sizes = [8, 32], strides = [1, 1]} : vector<8x64xf32> to vector<8x32xf32>
    %204 = vector.extract_strided_slice %192 {offsets = [0, 64], sizes = [8, 32], strides = [1, 1]} : vector<8x128xf32> to vector<8x32xf32>
    %205 = vector.extract_strided_slice %193 {offsets = [0, 64], sizes = [8, 32], strides = [1, 1]} : vector<8x128xf32> to vector<8x32xf32>
    %206 = arith.addf %205, %8 : vector<8x32xf32>
    %207 = arith.mulf %202, %206 : vector<8x32xf32>
    %208 = arith.addf %204, %207 : vector<8x32xf32>
    %209 = math.tanh %208 : vector<8x32xf32>
    %210 = arith.subf %187, %209 : vector<8x32xf32>
    %211 = arith.mulf %203, %210 : vector<8x32xf32>
    %212 = arith.addf %209, %211 : vector<8x32xf32>
    %213 = arith.truncf %212 : vector<8x32xf32> to vector<8x32xbf16>
    %cst_43 = arith.constant dense<0.000000e+00> : vector<8x128xf32>
    %214 = tpu.matmul %213, %4, %cst_43 {dimension_numbers = #tpu.dot_dimension_numbers<[1], [0], [0], [1], [0, 0, 1, 1], [], []>} : vector<8x32xbf16>, vector<32x128xbf16>, vector<8x128xf32> -> vector<8x128xf32>
    %215 = arith.addf %214, %11 : vector<8x128xf32>
    %c56 = arith.constant 56 : index
    %c0_44 = arith.constant 0 : index
    %216 = vector.load %arg3[%c56, %c0_44] : memref<64x128xf32, #tpu.memory_space<vmem>>, vector<8x128xf32>
    tpu.vector_store %arg3[%c56, %c0_44], %215 {strides = array<i32>} : memref<64x128xf32, #tpu.memory_space<vmem>>, vector<8x128xf32>,
    return
  }
}

</mosaic_0001>

<bundles_post_ra>
// kernel: tpu_custom_call.1
= control target key start
LH: loop header
LB: loop body
LE: loop exit
PB: predicated region body
PF: predicated region fallthrough
CT: control target
= control target key end

     0   :  { %vm50_vm0 = vcmask 130048   ;;  %s1102_s0 = inlined_call_operand.vmem [shape: f32[64,16], index: 0, kind: input, shape index: {}]   ;;  %s1103_s1 = inlined_call_operand.vmem [shape: bf16[80,128], index: 1, kind: input, shape index: {}]   ;;  %s1104_s2 = inlined_call_operand.vmem [shape: f32[8,128], index: 2, kind: input, shape index: {}]   ;;  %s1105_s3 = inlined_call_operand.hbm [shape: f32[64,128], index: 3, kind: output, shape index: {}]  }
   0x1   :  { %v924_v0 = vld [vmem:[%s1103_s1 + $0x10] sm:$0xff]  ;;  %v805_v1 = vld [vmem:[%s1103_s1] sm:$0xff]  ;;  %v17_v3 = vld [vmem:[%s1102_s0 + $0x8] sm:$0xff] }
   0x2   :  { %v16_v2 = vld [vmem:[%s1102_s0] sm:$0xff]  ;;  %114 = vmatpush.bf16.msra.mxu1 %v924_v0  ;;  %70 = vmatpush.bf16.msra.mxu0 %v805_v1  ;;  %v939_v4 = vld [vmem:[%s1103_s1 + $0x8] sm:$0xff] }
   0x3   :  { %v24_v5 = vpack.c.bf16 %v17_v3, %v16_v2  ;;  %v817_v6 = vld [vmem:[%s1104_s2 + $0x1] ss:$0 sm:$0xff]  ;;  %207 = vmatpush.bf16.msra.mxu3 %v924_v0 }
   0x6   :  { %592 = vmatpush.bf16.msrb.mxu0 %v924_v0 }
   0x7   :  { %8 = vsyncpa [#allocation3], 0  ;;  %s894_s24 = smov 64   ;;  %762 = vmatmul.msk.bf16.vlgmr.msra.gmra.mxu0 %vm50_vm0, %v24_v5  ;;  %115 = vmatpush.bf16.msra.mxu1 %v939_v4  ;;  %v895_v7 = vmov 0   ;;  %v958_v12 = vld [vmem:[%s1104_s2] ss:$0 sm:$0xff] }
   0x8   :  { %142 = vrot.lane.b32.xlu0 %v817_v6, %s894_s24  ;;  %208 = vmatpush.bf16.msra.mxu3 %v939_v4  ;;  %s896_s27 = smov 96   ;;  %s897_s28 = smov 32   ;;  %v967_v37 = vld [vmem:[%s1103_s1 + $0x20] sm:$0xff]  ;;  %v973_v38 = vld [vmem:[%s1103_s1 + $0x18] sm:$0xff]  ;;  %vm104_vm5 = vcmask 261120  }
   0x9   :  { %193 = vmatpush.bf16.msra.mxu2 %v967_v37  ;;  %v994_v43 = vld [vmem:[%s1104_s2 + $0x2] ss:$0 sm:$0xff]  ;;  %s746_s21 = sshll.u32 %s1105_s3, 4  ;;  %s899_s22 = smov 128   ;;  %s747_s21 = int_to_ptr.hbm [resolvable:$true] %s746_s21 }
   0xa   :  { %593 = vmatpush.bf16.msrb.mxu0 %v939_v4  ;;  %116 = vmatmul.bf16.vlgmr.msra.gmra.mxu1 %v895_v7  ;;  %s900_s23 = smov 8  }
   0xb   :  { %270 = vmatpush.bf16.msrb.mxu1 %v967_v37 }
   0xc   :  { %347 = vmatpush.bf16.msrb.mxu3 %v967_v37 }
   0xd   :  { %194 = vmatpush.bf16.msra.mxu2 %v973_v38 }
   0xf   :  { %271 = vmatpush.bf16.msrb.mxu1 %v973_v38 }
  0x10   :  { %348 = vmatpush.bf16.msrb.mxu3 %v973_v38 }
  0x11   :  { %284 = vmatpush.bf16.msrb.mxu2 %v924_v0 }
  0x13   :  { %361 = vmatpush.bf16.msra.mxu1 %v924_v0 }
  0x15   :  { %285 = vmatpush.bf16.msrb.mxu2 %v939_v4 }
  0x17   :  { %362 = vmatpush.bf16.msra.mxu1 %v939_v4 }
  0x7a   :  { %v951_v8 = vpop.permute.xlu0 %142 }
  0x84   :  { %v72_v13 = vpop.f32.mrf.mxu0 }
  0x85   :  { %v73_v14 = vadd.f32 %v958_v12, %v72_v13 }
  0x87   :  { %v117_v9 = vpop.f32.mrf.mxu1 }
  0x88   :  { %v145_v10 = vadd.f32 %v951_v8, %v117_v9  ;;  %v121_v15 = vadd.f32 %v117_v9, %v73_v14 }
  0x8a   :  { %147 = vrot.lane.b32.xlu0 %v145_v10, %s894_s24  ;;  %v774_v16 = vmul.f32 -1.442695, %v121_v15 }
  0x8c   :  { %820 = vpow2.f32 %v774_v16  ;;  %v74_v50 = vpop.f32.mrf.mxu0 }
  0x8d   :  { %v75_v51 = vadd.f32 %v958_v12, %v74_v50 }
  0x8f   :  { %v119_v11 = vpop.f32.mrf.mxu1 }
  0x92   :  { %v821_v17 = vpop.eup %820 }
  0x93   :  { %v125_v18 = vadd.f32 1.0, %v821_v17  ;;  %v18_v17 = vld [vmem:[%s1102_s0 + $0x10] sm:$0xff] }
  0x95   :  { %822 = vrcp.f32 %v125_v18  ;;  %v137_v24 = vand.u32 2147483648, %v125_v18  ;;  %vm131_vm2 = vweird.f32 %v125_v18  ;;  %v135_v25 = vand.u32 2147483647, %v125_v18 }
  0x97   :  { %v138_v27 = vor.u32 1.1754944e-38, %v137_v24  ;;  %vm136_vm4 = vcmp.eq.f32.partialorder %v135_v25, 8.507059e+37 }
  0x9b   :  { %v823_v19 = vpop.eup %822 }
  0x9c   :  { %v127_v20 = vmul.f32 %v823_v19, %v125_v18  ;;  %vm132_vm1 = vweird.f32 %v823_v19  ;;  %v19_v18 = vld [vmem:[%s1102_s0 + $0x18] sm:$0xff] }
  0x9d   :  { %vm133_vm3 = vmor %vm131_vm2, %vm132_vm1 }
  0x9e   :  { %v128_v21 = vsub.f32 1.0, %v127_v20 }
  0xa0   :  { %v129_v22 = vmul.f32 %v823_v19, %v128_v21 }
  0xa2   :  { %v130_v23 = vadd.f32 %v823_v19, %v129_v22 }
  0xa4   :  { %v134_v26 = vsel %vm133_vm3, %v823_v19, %v130_v23  ;;  %v25_v19 = vpack.c.bf16 %v19_v18, %v18_v17 }
  0xa5   :  { %v139_v29 = vsel %vm136_vm4, %v138_v27, %v134_v26 }
  0xa6   :  { %763 = vmatmul.msk.bf16.gmra.mxu0 %vm50_vm0, %v25_v19 }
  0xfc   :  { %v148_v28 = vpop.permute.xlu0 %147 }
  0xfd   :  { %v150_v30 = vmul.f32 %v148_v28, %v139_v29 }
  0xff   :  { %152 = vrot.lane.b32.xlu1 %v150_v30, %s894_s24 }
 0x123   :  { %v77_v27 = vpop.f32.mrf.mxu0 }
 0x124   :  { %v78_v28 = vadd.f32 %v958_v12, %v77_v27 }
 0x171   :  { %v153_v31 = vpop.permute.xlu1 %152 }
 0x172   :  { %v155_v32 = vadd.f32 %v153_v31, %v73_v14 }
 0x174   :  { %824 = vtanh.f32 %v155_v32 }
 0x17a   :  { %v825_v33 = vpop.eup %824 }
 0x17b   :  { %v157_v34 = vsub.f32 0.0, %v825_v33 }
 0x17d   :  { %159 = vrot.lane.b32.xlu1 %v157_v34, %s896_s27 }
 0x1ef   :  { %v160_v35 = vpop.permute.xlu1 %159 }
 0x1f0   :  { %v162_v36 = vmul.f32 %v160_v35, %v139_v29 }
 0x1f2   :  { %164 = vrot.lane.b32.xlu2 %v162_v36, %s897_s28 }
 0x24c   :  { %v165_v39 = vpop.permute.xlu2 %164 }
 0x24d   :  { %v167_v40 = vadd.f32 %v825_v33, %v165_v39 }
 0x24f   :  { %v168_v41 = vpack.c.bf16 %v167_v40, %v167_v40 }
 0x251   :  { %170 = vrot.lane.b32.xlu2 %v168_v41, %s894_s24 }
 0x2ab   :  { %v171_v42 = vpop.permute.xlu2 %170 }
 0x2ac   :  { %783 = vmatmul.msk.bf16.vlgmr.msra.gmra.mxu2 %vm104_vm5, %v171_v42  ;;  %784 = vmatmul.msk.bf16.vlgmr.msra.gmra.mxu3 %vm104_vm5, %v171_v42 }
 0x2ad   :  { %438 = vmatpush.bf16.msra.mxu3 %v924_v0  ;;  %424 = vmatpush.bf16.msra.mxu2 %v967_v37 }
 0x2b1   :  { %439 = vmatpush.bf16.msra.mxu3 %v939_v4  ;;  %425 = vmatpush.bf16.msra.mxu2 %v973_v38 }
 0x32f   :  { %v196_v44 = vpop.f32.mrf.mxu2  ;;  %v210_v45 = vpop.f32.mrf.mxu3 }
 0x330   :  { %v197_v46 = vadd.f32 %v994_v43, %v196_v44  ;;  %v234_v47 = vadd.f32 %v210_v45, %v951_v8  ;;  %v214_v52 = vadd.f32 %v210_v45, %v75_v51 }
 0x332   :  { %200 = vst [vmem:[#allocation2] sm:$0xff] %v197_v46  ;;  %236 = vrot.lane.b32.xlu0 %v234_v47, %s894_s24  ;;  %v785_v53 = vmul.f32 -1.442695, %v214_v52 }
 0x334   :  { %826 = vpow2.f32 %v785_v53 }
 0x337   :  { %v198_v48 = vpop.f32.mrf.mxu2  ;;  %v212_v49 = vpop.f32.mrf.mxu3 }
 0x33a   :  { %v827_v54 = vpop.eup %826 }
 0x33b   :  { %v218_v55 = vadd.f32 1.0, %v827_v54 }
 0x33d   :  { %828 = vrcp.f32 %v218_v55  ;;  %v230_v61 = vand.u32 2147483648, %v218_v55  ;;  %vm224_vm7 = vweird.f32 %v218_v55  ;;  %v228_v62 = vand.u32 2147483647, %v218_v55 }
 0x33f   :  { %v231_v1 = vor.u32 1.1754944e-38, %v230_v61  ;;  %vm229_vm9 = vcmp.eq.f32.partialorder %v228_v62, 8.507059e+37 }
 0x343   :  { %v829_v56 = vpop.eup %828 }
 0x344   :  { %v220_v57 = vmul.f32 %v829_v56, %v218_v55  ;;  %vm225_vm6 = vweird.f32 %v829_v56 }
 0x345   :  { %vm226_vm8 = vmor %vm224_vm7, %vm225_vm6 }
 0x346   :  { %v221_v58 = vsub.f32 1.0, %v220_v57 }
 0x348   :  { %v222_v59 = vmul.f32 %v829_v56, %v221_v58 }
 0x34a   :  { %v223_v60 = vadd.f32 %v829_v56, %v222_v59 }
 0x34c   :  { %v227_v63 = vsel %vm226_vm8, %v829_v56, %v223_v60 }
 0x34d   :  { %v232_v3 = vsel %vm229_vm9, %v231_v1, %v227_v63  ;;  %v79_v1 = vpop.f32.mrf.mxu0 }
 0x3a4   :  { %v237_v2 = vpop.permute.xlu0 %236 }
 0x3a5   :  { %v239_v5 = vmul.f32 %v237_v2, %v232_v3  ;;  %v80_v2 = vadd.f32 %v958_v12, %v79_v1 }
 0x3a7   :  { %241 = vrot.lane.b32.xlu1 %v239_v5, %s894_s24 }
 0x419   :  { %v242_v6 = vpop.permute.xlu1 %241 }
 0x41a   :  { %v244_v7 = vadd.f32 %v242_v6, %v75_v51 }
 0x41c   :  { %830 = vtanh.f32 %v244_v7 }
 0x422   :  { %v831_v9 = vpop.eup %830 }
 0x423   :  { %v246_v10 = vsub.f32 %v167_v40, %v831_v9 }
 0x425   :  { %248 = vrot.lane.b32.xlu2 %v246_v10, %s896_s27 }
 0x47f   :  { %v249_v11 = vpop.permute.xlu2 %248 }
 0x480   :  { %v251_v13 = vmul.f32 %v249_v11, %v232_v3 }
 0x482   :  { %253 = vrot.lane.b32.xlu0 %v251_v13, %s897_s28 }
 0x4f4   :  { %v254_v14 = vpop.permute.xlu0 %253 }
 0x4f5   :  { %v256_v15 = vadd.f32 %v831_v9, %v254_v14 }
 0x4f7   :  { %v257_v16 = vpack.c.bf16 %v256_v15, %v256_v15 }
 0x4f9   :  { %259 = vrot.lane.b32.xlu1 %v257_v16, %s894_s24 }
 0x56b   :  { %v260_v20 = vpop.permute.xlu1 %259 }
 0x56c   :  { %786 = vmatmul.msk.bf16.vlgmr.msrb.gmra.mxu1 %vm104_vm5, %v260_v20  ;;  %787 = vmatmul.msk.bf16.vlgmr.msrb.gmra.mxu2 %vm104_vm5, %v260_v20 }
 0x56d   :  { %515 = vmatpush.bf16.msrb.mxu2 %v924_v0  ;;  %501 = vmatpush.bf16.msrb.mxu1 %v967_v37 }
 0x571   :  { %516 = vmatpush.bf16.msrb.mxu2 %v939_v4  ;;  %502 = vmatpush.bf16.msrb.mxu1 %v973_v38 }
 0x5e9   :  { %v273_v21 = vpop.f32.mrf.mxu1 }
 0x5ea   :  { %v274_v22 = vadd.f32 %v994_v43, %v273_v21 }
 0x5ec   :  { %277 = vst [vmem:[#allocation2 + $0x8] sm:$0xff] %v274_v22 }
 0x5ef   :  { %v287_v23 = vpop.f32.mrf.mxu2 }
 0x5f0   :  { %v311_v24 = vadd.f32 %v287_v23, %v951_v8  ;;  %v291_v29 = vadd.f32 %v287_v23, %v78_v28 }
 0x5f1   :  { %v275_v25 = vpop.f32.mrf.mxu1 }
 0x5f2   :  { %313 = vrot.lane.b32.xlu2 %v311_v24, %s894_s24  ;;  %v788_v30 = vmul.f32 -1.442695, %v291_v29 }
 0x5f4   :  { %832 = vpow2.f32 %v788_v30 }
 0x5f7   :  { %v289_v26 = vpop.f32.mrf.mxu2 }
 0x5fa   :  { %v833_v31 = vpop.eup %832 }
 0x5fb   :  { %v295_v32 = vadd.f32 1.0, %v833_v31  ;;  %v20_v31 = vld [vmem:[%s1102_s0 + $0x20] sm:$0xff] }
 0x5fd   :  { %834 = vrcp.f32 %v295_v32  ;;  %v307_v40 = vand.u32 2147483648, %v295_v32  ;;  %vm301_vm11 = vweird.f32 %v295_v32  ;;  %v305_v41 = vand.u32 2147483647, %v295_v32 }
 0x5ff   :  { %v308_v44 = vor.u32 1.1754944e-38, %v307_v40  ;;  %vm306_vm13 = vcmp.eq.f32.partialorder %v305_v41, 8.507059e+37 }
 0x603   :  { %v835_v33 = vpop.eup %834 }
 0x604   :  { %v297_v34 = vmul.f32 %v835_v33, %v295_v32  ;;  %vm302_vm10 = vweird.f32 %v835_v33  ;;  %v21_v32 = vld [vmem:[%s1102_s0 + $0x28] sm:$0xff] }
 0x605   :  { %vm303_vm12 = vmor %vm301_vm11, %vm302_vm10 }
 0x606   :  { %v298_v35 = vsub.f32 1.0, %v297_v34 }
 0x608   :  { %v299_v36 = vmul.f32 %v835_v33, %v298_v35 }
 0x60a   :  { %v300_v39 = vadd.f32 %v835_v33, %v299_v36 }
 0x60c   :  { %v304_v42 = vsel %vm303_vm12, %v835_v33, %v300_v39  ;;  %v26_v33 = vpack.c.bf16 %v21_v32, %v20_v31 }
 0x60d   :  { %v309_v46 = vsel %vm306_vm13, %v308_v44, %v304_v42 }
 0x60e   :  { %764 = vmatmul.msk.bf16.gmra.mxu0 %vm50_vm0, %v26_v33 }
 0x64c   :  { %v314_v45 = vpop.permute.xlu2 %313 }
 0x64d   :  { %v316_v47 = vmul.f32 %v314_v45, %v309_v46 }
 0x64f   :  { %318 = vrot.lane.b32.xlu0 %v316_v47, %s894_s24 }
 0x68b   :  { %v82_v44 = vpop.f32.mrf.mxu0 }
 0x6c1   :  { %v319_v48 = vpop.permute.xlu0 %318 }
 0x6c2   :  { %v321_v49 = vadd.f32 %v319_v48, %v78_v28 }
 0x6c4   :  { %836 = vtanh.f32 %v321_v49 }
 0x6ca   :  { %v837_v50 = vpop.eup %836 }
 0x6cb   :  { %v323_v51 = vsub.f32 %v256_v15, %v837_v50 }
 0x6cd   :  { %325 = vrot.lane.b32.xlu1 %v323_v51, %s896_s27 }
 0x73f   :  { %v326_v52 = vpop.permute.xlu1 %325 }
 0x740   :  { %v328_v53 = vmul.f32 %v326_v52, %v309_v46 }
 0x742   :  { %330 = vrot.lane.b32.xlu2 %v328_v53, %s897_s28 }
 0x79c   :  { %v331_v54 = vpop.permute.xlu2 %330 }
 0x79d   :  { %v333_v55 = vadd.f32 %v837_v50, %v331_v54 }
 0x79f   :  { %v334_v56 = vpack.c.bf16 %v333_v55, %v333_v55 }
 0x7a1   :  { %336 = vrot.lane.b32.xlu0 %v334_v56, %s894_s24 }
 0x813   :  { %v337_v57 = vpop.permute.xlu0 %336 }
 0x814   :  { %789 = vmatmul.msk.bf16.vlgmr.msrb.gmra.mxu3 %vm104_vm5, %v337_v57  ;;  %790 = vmatmul.msk.bf16.vlgmr.msra.gmra.mxu1 %vm104_vm5, %v337_v57 }
 0x815   :  { %578 = vmatpush.bf16.msrb.mxu3 %v967_v37  ;;  %655 = vmatpush.bf16.msra.mxu1 %v967_v37 }
 0x819   :  { %579 = vmatpush.bf16.msrb.mxu3 %v973_v38  ;;  %656 = vmatpush.bf16.msra.mxu1 %v973_v38 }
 0x891   :  { %v364_v58 = vpop.f32.mrf.mxu1 }
 0x892   :  { %v388_v59 = vadd.f32 %v364_v58, %v951_v8  ;;  %v368_v3 = vadd.f32 %v364_v58, %v80_v2 }
 0x894   :  { %390 = vrot.lane.b32.xlu1 %v388_v59, %s894_s24  ;;  %v791_v5 = vmul.f32 -1.442695, %v368_v3 }
 0x896   :  { %838 = vpow2.f32 %v791_v5 }
 0x897   :  { %v350_v60 = vpop.f32.mrf.mxu3 }
 0x898   :  { %v351_v61 = vadd.f32 %v994_v43, %v350_v60 }
 0x899   :  { %v366_v62 = vpop.f32.mrf.mxu1 }
 0x89a   :  { %354 = vst [vmem:[#allocation2 + $0x10] sm:$0xff] %v351_v61 }
 0x89c   :  { %v839_v6 = vpop.eup %838 }
 0x89d   :  { %v372_v7 = vadd.f32 1.0, %v839_v6 }
 0x89f   :  { %v352_v63 = vpop.f32.mrf.mxu3  ;;  %840 = vrcp.f32 %v372_v7  ;;  %v384_v15 = vand.u32 2147483648, %v372_v7  ;;  %vm378_vm15 = vweird.f32 %v372_v7  ;;  %v382_v16 = vand.u32 2147483647, %v372_v7 }
 0x8a1   :  { %v385_v18 = vor.u32 1.1754944e-38, %v384_v15  ;;  %vm383_vm2 = vcmp.eq.f32.partialorder %v382_v16, 8.507059e+37 }
 0x8a5   :  { %v841_v9 = vpop.eup %840 }
 0x8a6   :  { %v374_v10 = vmul.f32 %v841_v9, %v372_v7  ;;  %vm379_vm14 = vweird.f32 %v841_v9 }
 0x8a7   :  { %vm380_vm1 = vmor %vm378_vm15, %vm379_vm14 }
 0x8a8   :  { %v375_v11 = vsub.f32 1.0, %v374_v10 }
 0x8aa   :  { %v376_v13 = vmul.f32 %v841_v9, %v375_v11 }
 0x8ac   :  { %v377_v14 = vadd.f32 %v841_v9, %v376_v13 }
 0x8ae   :  { %v381_v17 = vsel %vm380_vm1, %v841_v9, %v377_v14  ;;  %v84_v14 = vpop.f32.mrf.mxu0 }
 0x8af   :  { %v386_v20 = vsel %vm383_vm2, %v385_v18, %v381_v17  ;;  %v85_v15 = vadd.f32 %v958_v12, %v84_v14 }
 0x906   :  { %v391_v19 = vpop.permute.xlu1 %390 }
 0x907   :  { %v393_v21 = vmul.f32 %v391_v19, %v386_v20 }
 0x909   :  { %395 = vrot.lane.b32.xlu2 %v393_v21, %s894_s24 }
 0x963   :  { %v396_v22 = vpop.permute.xlu2 %395 }
 0x964   :  { %v398_v23 = vadd.f32 %v396_v22, %v80_v2 }
 0x966   :  { %842 = vtanh.f32 %v398_v23 }
 0x96c   :  { %v843_v24 = vpop.eup %842 }
 0x96d   :  { %v400_v25 = vsub.f32 %v333_v55, %v843_v24 }
 0x96f   :  { %402 = vrot.lane.b32.xlu0 %v400_v25, %s896_s27 }
 0x9e1   :  { %v403_v26 = vpop.permute.xlu0 %402 }
 0x9e2   :  { %v405_v27 = vmul.f32 %v403_v26, %v386_v20 }
 0x9e4   :  { %407 = vrot.lane.b32.xlu1 %v405_v27, %s897_s28 }
 0xa56   :  { %v408_v28 = vpop.permute.xlu1 %407 }
 0xa57   :  { %v410_v29 = vadd.f32 %v843_v24, %v408_v28 }
 0xa59   :  { %v411_v30 = vpack.c.bf16 %v410_v29, %v410_v29 }
 0xa5b   :  { %413 = vrot.lane.b32.xlu2 %v411_v30, %s894_s24 }
 0xab5   :  { %v414_v34 = vpop.permute.xlu2 %413 }
 0xab6   :  { %792 = vmatmul.msk.bf16.vlgmr.msra.gmra.mxu2 %vm104_vm5, %v414_v34  ;;  %793 = vmatmul.msk.bf16.vlgmr.msra.gmra.mxu3 %vm104_vm5, %v414_v34 }
 0xab7   :  { %669 = vmatpush.bf16.msra.mxu2 %v924_v0  ;;  %732 = vmatpush.bf16.msra.mxu3 %v967_v37  ;;  %v83_v0 = vadd.f32 %v958_v12, %v82_v44 }
 0xabb   :  { %670 = vmatpush.bf16.msra.mxu2 %v939_v4  ;;  %733 = vmatpush.bf16.msra.mxu3 %v973_v38 }
 0xb39   :  { %v427_v35 = vpop.f32.mrf.mxu2  ;;  %v441_v36 = vpop.f32.mrf.mxu3 }
 0xb3a   :  { %v428_v39 = vadd.f32 %v994_v43, %v427_v35  ;;  %v465_v40 = vadd.f32 %v441_v36, %v951_v8  ;;  %v445_v45 = vadd.f32 %v441_v36, %v83_v0 }
 0xb3c   :  { %431 = vst [vmem:[#allocation2 + $0x18] sm:$0xff] %v428_v39  ;;  %467 = vrot.lane.b32.xlu0 %v465_v40, %s894_s24  ;;  %v794_v37 = vmul.f32 -1.442695, %v445_v45  ;;  %v22_v40 = vld [vmem:[%s1102_s0 + $0x30] sm:$0xff] }
 0xb3e   :  { %844 = vpow2.f32 %v794_v37 }
 0xb41   :  { %v429_v41 = vpop.f32.mrf.mxu2  ;;  %v443_v42 = vpop.f32.mrf.mxu3 }
 0xb42   :  { %v23_v41 = vld [vmem:[%s1102_s0 + $0x38] sm:$0xff]  ;;  %s898_s0 = smov [#allocation2]  }
 0xb43   :  { %v27_v42 = vpack.c.bf16 %v23_v41, %v22_v40  ;;  %s744_s18 = sshll.u32 %s898_s0, 4  ;;  %s745_s18 = int_to_ptr.vmem [resolvable:$true] %s744_s18 }
 0xb44   :  { %v845_v4 = vpop.eup %844 }
 0xb45   :  { %v449_v46 = vadd.f32 1.0, %v845_v4  ;;  %765 = vmatmul.msk.bf16.gmra.mxu0 %vm50_vm0, %v27_v42 }
 0xb47   :  { %846 = vrcp.f32 %v449_v46  ;;  %v461_v51 = vand.u32 2147483648, %v449_v46  ;;  %vm455_vm4 = vweird.f32 %v449_v46  ;;  %v459_v52 = vand.u32 2147483647, %v449_v46 }
 0xb49   :  { %v462_v54 = vor.u32 1.1754944e-38, %v461_v51  ;;  %vm460_vm7 = vcmp.eq.f32.partialorder %v459_v52, 8.507059e+37 }
 0xb4d   :  { %v847_v38 = vpop.eup %846 }
 0xb4e   :  { %v451_v47 = vmul.f32 %v847_v38, %v449_v46  ;;  %vm456_vm3 = vweird.f32 %v847_v38 }
 0xb4f   :  { %vm457_vm6 = vmor %vm455_vm4, %vm456_vm3 }
 0xb50   :  { %v452_v48 = vsub.f32 1.0, %v451_v47 }
 0xb52   :  { %v453_v49 = vmul.f32 %v847_v38, %v452_v48 }
 0xb54   :  { %v454_v50 = vadd.f32 %v847_v38, %v453_v49 }
 0xb56   :  { %v458_v53 = vsel %vm457_vm6, %v847_v38, %v454_v50 }
 0xb57   :  { %v463_v56 = vsel %vm460_vm7, %v462_v54, %v458_v53 }
 0xbae   :  { %v468_v55 = vpop.permute.xlu0 %467 }
 0xbaf   :  { %v470_v57 = vmul.f32 %v468_v55, %v463_v56 }
 0xbb1   :  { %472 = vrot.lane.b32.xlu1 %v470_v57, %s894_s24 }
 0xbc2   :  { %v87_v4 = vpop.f32.mrf.mxu0 }
 0xbc3   :  { %v88_v52 = vadd.f32 %v958_v12, %v87_v4 }
 0xbca   :  { %v89_v46 = vpop.f32.mrf.mxu0 }
 0xc23   :  { %v473_v58 = vpop.permute.xlu1 %472 }
 0xc24   :  { %v475_v59 = vadd.f32 %v473_v58, %v83_v0 }
 0xc26   :  { %848 = vtanh.f32 %v475_v59 }
 0xc2c   :  { %v849_v60 = vpop.eup %848 }
 0xc2d   :  { %v477_v61 = vsub.f32 %v410_v29, %v849_v60 }
 0xc2f   :  { %479 = vrot.lane.b32.xlu2 %v477_v61, %s896_s27 }
 0xc89   :  { %v480_v62 = vpop.permute.xlu2 %479 }
 0xc8a   :  { %v482_v63 = vmul.f32 %v480_v62, %v463_v56 }
 0xc8c   :  { %484 = vrot.lane.b32.xlu0 %v482_v63, %s897_s28 }
 0xcfe   :  { %v485_v1 = vpop.permute.xlu0 %484 }
 0xcff   :  { %v487_v2 = vadd.f32 %v849_v60, %v485_v1 }
 0xd01   :  { %v488_v3 = vpack.c.bf16 %v487_v2, %v487_v2 }
 0xd03   :  { %490 = vrot.lane.b32.xlu1 %v488_v3, %s894_s24 }
 0xd75   :  { %v491_v5 = vpop.permute.xlu1 %490 }
 0xd76   :  { %795 = vmatmul.msk.bf16.vlgmr.msrb.gmra.mxu1 %vm104_vm5, %v491_v5  ;;  %796 = vmatmul.msk.bf16.vlgmr.msrb.gmra.mxu2 %vm104_vm5, %v491_v5 }
 0xdf3   :  { %v504_v6 = vpop.f32.mrf.mxu1 }
 0xdf4   :  { %v505_v7 = vadd.f32 %v994_v43, %v504_v6 }
 0xdf6   :  { %508 = vst [vmem:[#allocation2 + $0x20] sm:$0xff] %v505_v7 }
 0xdf9   :  { %v518_v9 = vpop.f32.mrf.mxu2 }
 0xdfa   :  { %v542_v10 = vadd.f32 %v518_v9, %v951_v8  ;;  %v522_v16 = vadd.f32 %v518_v9, %v85_v15 }
 0xdfb   :  { %v506_v11 = vpop.f32.mrf.mxu1 }
 0xdfc   :  { %544 = vrot.lane.b32.xlu2 %v542_v10, %s894_s24  ;;  %v797_v17 = vmul.f32 -1.442695, %v522_v16 }
 0xdfe   :  { %850 = vpow2.f32 %v797_v17 }
 0xe01   :  { %v520_v13 = vpop.f32.mrf.mxu2 }
 0xe04   :  { %v851_v18 = vpop.eup %850 }
 0xe05   :  { %v526_v19 = vadd.f32 1.0, %v851_v18 }
 0xe07   :  { %852 = vrcp.f32 %v526_v19  ;;  %v538_v25 = vand.u32 2147483648, %v526_v19  ;;  %vm532_vm9 = vweird.f32 %v526_v19  ;;  %v536_v26 = vand.u32 2147483647, %v526_v19 }
 0xe09   :  { %v539_v28 = vor.u32 1.1754944e-38, %v538_v25  ;;  %vm537_vm11 = vcmp.eq.f32.partialorder %v536_v26, 8.507059e+37  ;;  %v90_v25 = vadd.f32 %v958_v12, %v89_v46 }
 0xe0d   :  { %v853_v20 = vpop.eup %852 }
 0xe0e   :  { %v528_v21 = vmul.f32 %v853_v20, %v526_v19  ;;  %vm533_vm8 = vweird.f32 %v853_v20 }
 0xe0f   :  { %vm534_vm10 = vmor %vm532_vm9, %vm533_vm8 }
 0xe10   :  { %v529_v22 = vsub.f32 1.0, %v528_v21 }
 0xe12   :  { %v530_v23 = vmul.f32 %v853_v20, %v529_v22 }
 0xe14   :  { %v531_v24 = vadd.f32 %v853_v20, %v530_v23 }
 0xe16   :  { %v535_v27 = vsel %vm534_vm10, %v853_v20, %v531_v24 }
 0xe17   :  { %v540_v30 = vsel %vm537_vm11, %v539_v28, %v535_v27 }
 0xe56   :  { %v545_v29 = vpop.permute.xlu2 %544 }
 0xe57   :  { %v547_v31 = vmul.f32 %v545_v29, %v540_v30 }
 0xe59   :  { %549 = vrot.lane.b32.xlu0 %v547_v31, %s894_s24 }
 0xecb   :  { %v550_v32 = vpop.permute.xlu0 %549 }
 0xecc   :  { %v552_v33 = vadd.f32 %v550_v32, %v85_v15 }
 0xece   :  { %854 = vtanh.f32 %v552_v33 }
 0xed4   :  { %v855_v34 = vpop.eup %854 }
 0xed5   :  { %v554_v35 = vsub.f32 %v487_v2, %v855_v34 }
 0xed7   :  { %556 = vrot.lane.b32.xlu1 %v554_v35, %s896_s27 }
 0xf49   :  { %v557_v36 = vpop.permute.xlu1 %556 }
 0xf4a   :  { %v559_v39 = vmul.f32 %v557_v36, %v540_v30 }
 0xf4c   :  { %561 = vrot.lane.b32.xlu2 %v559_v39, %s897_s28 }
 0xfa6   :  { %v562_v44 = vpop.permute.xlu2 %561 }
 0xfa7   :  { %v564_v0 = vadd.f32 %v855_v34, %v562_v44 }
 0xfa9   :  { %v565_v45 = vpack.c.bf16 %v564_v0, %v564_v0 }
 0xfab   :  { %567 = vrot.lane.b32.xlu0 %v565_v45, %s894_s24 }
0x101d   :  { %v568_v37 = vpop.permute.xlu0 %567 }
0x101e   :  { %798 = vmatmul.msk.bf16.vlgmr.msrb.gmra.mxu3 %vm104_vm5, %v568_v37  ;;  %799 = vmatmul.msk.bf16.vlgmr.msrb.gmra.mxu0 %vm104_vm5, %v568_v37 }
0x109b   :  { %v595_v38 = vpop.f32.mrf.mxu0 }
0x109c   :  { %v619_v47 = vadd.f32 %v595_v38, %v951_v8  ;;  %v599_v53 = vadd.f32 %v595_v38, %v88_v52 }
0x109e   :  { %621 = vrot.lane.b32.xlu1 %v619_v47, %s894_s24  ;;  %v800_v54 = vmul.f32 -1.442695, %v599_v53 }
0x10a0   :  { %856 = vpow2.f32 %v800_v54 }
0x10a1   :  { %v581_v48 = vpop.f32.mrf.mxu3 }
0x10a2   :  { %v582_v49 = vadd.f32 %v994_v43, %v581_v48 }
0x10a3   :  { %v597_v50 = vpop.f32.mrf.mxu0 }
0x10a4   :  { %585 = vst [vmem:[#allocation2 + $0x28] sm:$0xff] %v582_v49 }
0x10a6   :  { %v857_v55 = vpop.eup %856 }
0x10a7   :  { %v603_v56 = vadd.f32 1.0, %v857_v55 }
0x10a9   :  { %v583_v51 = vpop.f32.mrf.mxu3  ;;  %858 = vrcp.f32 %v603_v56  ;;  %v615_v62 = vand.u32 2147483648, %v603_v56  ;;  %vm609_vm12 = vweird.f32 %v603_v56  ;;  %v613_v63 = vand.u32 2147483647, %v603_v56 }
0x10ab   :  { %v616_v2 = vor.u32 1.1754944e-38, %v615_v62  ;;  %vm614_vm14 = vcmp.eq.f32.partialorder %v613_v63, 8.507059e+37 }
0x10af   :  { %v859_v57 = vpop.eup %858 }
0x10b0   :  { %v605_v58 = vmul.f32 %v859_v57, %v603_v56  ;;  %vm610_vm0 = vweird.f32 %v859_v57 }
0x10b1   :  { %vm611_vm13 = vmor %vm609_vm12, %vm610_vm0 }
0x10b2   :  { %v606_v59 = vsub.f32 1.0, %v605_v58 }
0x10b4   :  { %v607_v60 = vmul.f32 %v859_v57, %v606_v59 }
0x10b6   :  { %v608_v61 = vadd.f32 %v859_v57, %v607_v60 }
0x10b8   :  { %v612_v1 = vsel %vm611_vm13, %v859_v57, %v608_v61 }
0x10b9   :  { %v617_v5 = vsel %vm614_vm14, %v616_v2, %v612_v1 }
0x1110   :  { %v622_v3 = vpop.permute.xlu1 %621 }
0x1111   :  { %v624_v6 = vmul.f32 %v622_v3, %v617_v5 }
0x1113   :  { %626 = vrot.lane.b32.xlu2 %v624_v6, %s894_s24 }
0x116d   :  { %v627_v7 = vpop.permute.xlu2 %626 }
0x116e   :  { %v629_v9 = vadd.f32 %v627_v7, %v88_v52 }
0x1170   :  { %860 = vtanh.f32 %v629_v9 }
0x1176   :  { %v861_v10 = vpop.eup %860 }
0x1177   :  { %v631_v11 = vsub.f32 %v564_v0, %v861_v10 }
0x1179   :  { %633 = vrot.lane.b32.xlu0 %v631_v11, %s896_s27 }
0x11eb   :  { %v634_v13 = vpop.permute.xlu0 %633 }
0x11ec   :  { %v636_v14 = vmul.f32 %v634_v13, %v617_v5 }
0x11ee   :  { %638 = vrot.lane.b32.xlu1 %v636_v14, %s897_s28 }
0x1260   :  { %v639_v15 = vpop.permute.xlu1 %638 }
0x1261   :  { %v641_v16 = vadd.f32 %v861_v10, %v639_v15 }
0x1263   :  { %v642_v17 = vpack.c.bf16 %v641_v16, %v641_v16 }
0x1265   :  { %644 = vrot.lane.b32.xlu2 %v642_v17, %s894_s24 }
0x12bf   :  { %v645_v18 = vpop.permute.xlu2 %644 }
0x12c0   :  { %801 = vmatmul.msk.bf16.vlgmr.msra.gmra.mxu1 %vm104_vm5, %v645_v18  ;;  %802 = vmatmul.msk.bf16.vlgmr.msra.gmra.mxu2 %vm104_vm5, %v645_v18 }
0x133d   :  { %v658_v19 = vpop.f32.mrf.mxu1 }
0x133e   :  { %v659_v20 = vadd.f32 %v994_v43, %v658_v19 }
0x1340   :  { %662 = vst [vmem:[#allocation2 + $0x30] sm:$0xff] %v659_v20 }
0x1343   :  { %v672_v21 = vpop.f32.mrf.mxu2 }
0x1344   :  { %v696_v22 = vadd.f32 %v672_v21, %v951_v8  ;;  %v676_v26 = vadd.f32 %v672_v21, %v90_v25 }
0x1345   :  { %v660_v23 = vpop.f32.mrf.mxu1 }
0x1346   :  { %698 = vrot.lane.b32.xlu0 %v696_v22, %s894_s24  ;;  %v803_v27 = vmul.f32 -1.442695, %v676_v26 }
0x1348   :  { %862 = vpow2.f32 %v803_v27 }
0x134b   :  { %v674_v24 = vpop.f32.mrf.mxu2 }
0x134e   :  { %v863_v28 = vpop.eup %862 }
0x134f   :  { %v680_v29 = vadd.f32 1.0, %v863_v28 }
0x1351   :  { %864 = vrcp.f32 %v680_v29  ;;  %v692_v35 = vand.u32 2147483648, %v680_v29  ;;  %vm686_vm1 = vweird.f32 %v680_v29  ;;  %v690_v8 = vand.u32 2147483647, %v680_v29 }
0x1353   :  { %v693_v39 = vor.u32 1.1754944e-38, %v692_v35  ;;  %vm691_vm3 = vcmp.eq.f32.partialorder %v690_v8, 8.507059e+37 }
0x1357   :  { %v865_v30 = vpop.eup %864 }
0x1358   :  { %v682_v31 = vmul.f32 %v865_v30, %v680_v29  ;;  %vm687_vm15 = vweird.f32 %v865_v30 }
0x1359   :  { %vm688_vm2 = vmor %vm686_vm1, %vm687_vm15 }
0x135a   :  { %v683_v32 = vsub.f32 1.0, %v682_v31 }
0x135c   :  { %v684_v33 = vmul.f32 %v865_v30, %v683_v32 }
0x135e   :  { %v685_v34 = vadd.f32 %v865_v30, %v684_v33 }
0x1360   :  { %v689_v36 = vsel %vm688_vm2, %v865_v30, %v685_v34 }
0x1361   :  { %v694_v40 = vsel %vm691_vm3, %v693_v39, %v689_v36 }
0x13b8   :  { %v699_v12 = vpop.permute.xlu0 %698 }
0x13b9   :  { %v701_v41 = vmul.f32 %v699_v12, %v694_v40 }
0x13bb   :  { %703 = vrot.lane.b32.xlu1 %v701_v41, %s894_s24 }
0x142d   :  { %v704_v42 = vpop.permute.xlu1 %703 }
0x142e   :  { %v706_v44 = vadd.f32 %v704_v42, %v90_v25 }
0x1430   :  { %866 = vtanh.f32 %v706_v44 }
0x1436   :  { %v867_v0 = vpop.eup %866 }
0x1437   :  { %v708_v45 = vsub.f32 %v641_v16, %v867_v0 }
0x1439   :  { %710 = vrot.lane.b32.xlu2 %v708_v45, %s896_s27 }
0x1493   :  { %v711_v37 = vpop.permute.xlu2 %710 }
0x1494   :  { %v713_v4 = vmul.f32 %v711_v37, %v694_v40 }
0x1496   :  { %715 = vrot.lane.b32.xlu0 %v713_v4, %s897_s28 }
0x1508   :  { %v716_v46 = vpop.permute.xlu0 %715 }
0x1509   :  { %v718_v38 = vadd.f32 %v867_v0, %v716_v46 }
0x150b   :  { %v719_v47 = vpack.c.bf16 %v718_v38, %v718_v38 }
0x150d   :  { %721 = vrot.lane.b32.xlu1 %v719_v47, %s894_s24 }
0x157f   :  { %v722_v48 = vpop.permute.xlu1 %721 }
0x1580   :  { %804 = vmatmul.msk.bf16.vlgmr.msra.gmra.mxu3 %vm104_vm5, %v722_v48 }
0x1603   :  { %v735_v49 = vpop.f32.mrf.mxu3 }
0x1604   :  { %v736_v50 = vadd.f32 %v994_v43, %v735_v49 }
0x1606   :  { %739 = vst [vmem:[#allocation2 + $0x38] sm:$0xff] %v736_v50 }
0x1607   :  { %752 = dma.vmem_to_hbm [thread:$0]  %s745_s18, 1024, %s747_s21, [#allocation3], %s899_s22, %s899_s22, %s900_s23  }
0x160b   :  { %v737_v51 = vpop.f32.mrf.mxu3 }
0x160c   :  { %892 = dma.done.wait [#allocation3], 1024  }
0x160d   :  { %893 = vsyncadd [#allocation3], 4294966272 }
0x160e   :  { %757 = vsyncpa [#allocation3], 1 }

</bundles_post_ra>
